<compile_context>
chip_gen: v7x
topology: tpu7x:2x2x1
jax: 0.10.0
libtpu: 0.0.40
codegen_flags: <defaults>
</compile_context>

<pallas_src>
import jax
import jax.numpy as jnp
from jax import lax
from jax.experimental import pallas as pl
from jax.experimental.pallas import tpu as pltpu


def _self_attention_kernel(xq_ref, xkv_ref, bias_ref, wqkv_ref, wo_ref, o_ref,
                           q_scr, m_scr, l_scr, acc_scr):
    kv = pl.program_id(2)
    H = q_scr.shape[-1]
    wqkv = wqkv_ref[...]                                        # [H, 3H] bf16

    @pl.when(kv == 0)
    def _():
        # Project the query rows once per (batch, q-tile); keep only the q
        # slice and fold the 1/sqrt(H) scale into it here.
        proj_q = jnp.dot(xq_ref[0], wqkv,
                         preferred_element_type=jnp.float32)       # [tq, 3H]
        scale = 1.0 / jnp.sqrt(jnp.float32(H))
        q_scr[...] = (proj_q[:, :H] * scale).astype(q_scr.dtype)  # bf16
        m_scr[...] = jnp.full_like(m_scr, -jnp.inf)
        l_scr[...] = jnp.zeros_like(l_scr)
        acc_scr[...] = jnp.zeros_like(acc_scr)

    # Fused K/V projection for this kv tile (single lane-dense MXU pass).
    proj_kv = jnp.dot(xkv_ref[0], wqkv,
                      preferred_element_type=jnp.float32)          # [tk, 3H]
    k = proj_kv[:, H:2 * H].astype(jnp.bfloat16)
    v = proj_kv[:, 2 * H:3 * H].astype(jnp.bfloat16)

    # Scores: contract H of q against H of k directly (no k.T materialization).
    s = lax.dot_general(q_scr[...], k,
                        dimension_numbers=(((1,), (1,)), ((), ())),
                        preferred_element_type=jnp.float32)        # [tq, tk]
    s = s + bias_ref[0].astype(jnp.float32)    # additive mask bias (0 / -1e9)

    # Online softmax update.
    m_new = jnp.maximum(m_scr[...], jnp.max(s, axis=-1, keepdims=True))
    alpha = jnp.exp(m_scr[...] - m_new)
    p = jnp.exp(s - m_new)
    l_scr[...] = alpha * l_scr[...] + jnp.sum(p, axis=-1, keepdims=True)
    acc_scr[...] = alpha * acc_scr[...] + jnp.dot(
        p.astype(jnp.bfloat16), v, preferred_element_type=jnp.float32)
    m_scr[...] = m_new

    @pl.when(kv == pl.num_programs(2) - 1)
    def _():
        ctx = acc_scr[...] * pl.reciprocal(l_scr[...], approx=True)  # [tq, H]
        out = jnp.dot(ctx.astype(jnp.bfloat16), wo_ref[...],
                      preferred_element_type=jnp.float32)            # [tq, H]
        o_ref[0] = out.astype(o_ref.dtype)


def _pick_tile(S, candidates):
    """Largest candidate that divides S; fall back to the full extent."""
    for t in candidates:
        if S % t == 0:
            return t
    return S


def self_attention(x, mask, wq, wk, wv, wo, *, tq=None, tk=None):
    """x: [B,S,H] f32, mask: [B,S,S] f32 (1 keep / 0 mask), w*: [H,H] f32 -> [B,S,H] f32."""
    B, S, H = x.shape
    # tq lives on a sublane dim -> multiple of 8 (or full S).
    # tk lives on the lane dim of the bias block -> multiple of 128 (or full S).
    if tq is None:
        tq = _pick_tile(S, (256, 128, 64, 32, 16, 8))
    if tk is None:
        tk = _pick_tile(S, (256, 128))
    assert S % tq == 0 and S % tk == 0, "tile sizes must divide the sequence length"
    assert (tq % 8 == 0) or (tq == S)
    assert (tk % 128 == 0) or (tk == S)

    # bf16 operands for the MXU (f32 accumulation happens inside the kernel).
    x_bf = x.astype(jnp.bfloat16)
    wqkv = jnp.concatenate([wq, wk, wv], axis=1).astype(jnp.bfloat16)   # [H, 3H]
    wo_bf = wo.astype(jnp.bfloat16)
    # Pre-bake the mask as an additive bias (0 keep, -1e9 masked), bf16 to halve
    # the dominant [B,S,S] HBM stream.
    bias = ((1.0 - mask) * jnp.float32(-1e9)).astype(jnp.bfloat16)

    grid = (B, S // tq, S // tk)

    return pl.pallas_call(
        _self_attention_kernel,
        out_shape=jax.ShapeDtypeStruct((B, S, H), x.dtype),
        grid_spec=pltpu.PrefetchScalarGridSpec(
            num_scalar_prefetch=0,
            grid=grid,
            in_specs=[
                pl.BlockSpec((1, tq, H), lambda b, qi, ki: (b, qi, 0)),    # x (q rows)
                pl.BlockSpec((1, tk, H), lambda b, qi, ki: (b, ki, 0)),    # x (kv rows)
                pl.BlockSpec((1, tq, tk), lambda b, qi, ki: (b, qi, ki)),  # mask bias
                pl.BlockSpec((H, 3 * H), lambda b, qi, ki: (0, 0)),        # Wqkv fused
                pl.BlockSpec((H, H), lambda b, qi, ki: (0, 0)),            # Wo
            ],
            out_specs=pl.BlockSpec((1, tq, H), lambda b, qi, ki: (b, qi, 0)),
            scratch_shapes=[
                pltpu.VMEM((tq, H), jnp.bfloat16),   # scaled q
                pltpu.VMEM((tq, 1), jnp.float32),    # running max m
                pltpu.VMEM((tq, 1), jnp.float32),    # running sum l
                pltpu.VMEM((tq, H), jnp.float32),    # output accumulator
            ],
        ),
        compiler_params=pltpu.CompilerParams(
            dimension_semantics=("parallel", "parallel", "arbitrary"),
        ),
    )(x_bf, x_bf, bias, wqkv, wo_bf)


def _reference(x, mask, wq, wk, wv, wo):
    """f32 math on bf16-rounded operands, mirroring the kernel's MXU precision."""
    bf, f32 = jnp.bfloat16, jnp.float32
    r = lambda a: a.astype(bf).astype(f32)
    H = x.shape[-1]
    wqkv = jnp.concatenate([wq, wk, wv], axis=1)
    proj = jnp.einsum("bsh,hd->bsd", r(x), r(wqkv))
    q = proj[..., :H] / jnp.sqrt(f32(H))
    k, v = proj[..., H:2 * H], proj[..., 2 * H:]
    s = jnp.einsum("bqh,bkh->bqk", r(q), r(k))
    s = s + r((1.0 - mask) * f32(-1e9))
    p = jax.nn.softmax(s, axis=-1)
    ctx = jnp.einsum("bqk,bkh->bqh", r(p), r(v))
    return jnp.einsum("bqh,hd->bqd", r(ctx), r(wo)).astype(x.dtype)


if __name__ == "__main__":
    B, S, H = 2, 8, 32  # batch, seq, hid_dim

    key = jax.random.PRNGKey(0)
    kx, kq, kk, kv, ko, km = jax.random.split(key, 6)

    x = jax.random.normal(kx, (B, S, H), dtype=jnp.float32)

    # Deterministic parameter init (Xavier-ish scaling).
    scale = 1.0 / jnp.sqrt(jnp.float32(H))
    wq = jax.random.normal(kq, (H, H), dtype=jnp.float32) * scale
    wk = jax.random.normal(kk, (H, H), dtype=jnp.float32) * scale
    wv = jax.random.normal(kv, (H, H), dtype=jnp.float32) * scale
    wo = jax.random.normal(ko, (H, H), dtype=jnp.float32) * scale

    # Causal-ish random mask: keep lower triangle, drop a few random entries,
    # but guarantee every query attends to at least itself.
    causal = jnp.tril(jnp.ones((S, S), dtype=jnp.float32))
    rnd = (jax.random.uniform(km, (B, S, S)) > 0.1).astype(jnp.float32)
    mask = jnp.maximum(causal[None] * rnd, jnp.eye(S, dtype=jnp.float32)[None])

    out = self_attention(x, mask, wq, wk, wv, wo)
    out = jax.block_until_ready(out)

    ref = _reference(x, mask, wq, wk, wv, wo)
    assert out.shape == (B, S, H)
    # bf16 MXU operands + approx reciprocal -> compare against the bf16-rounded
    # reference with a correspondingly loose tolerance.
    assert jnp.allclose(out, ref, atol=5e-2, rtol=5e-2), "mismatch vs JAX reference"

    print("KERNEL_OK")
</pallas_src>

<mosaic_0001>
module attributes {stable_mosaic.version = 11 : i64} {
  func.func @_self_attention_kernel(%arg0: i32, %arg1: i32, %arg2: i32, %arg3: memref<1x8x32xbf16, #tpu.memory_space<vmem>>, %arg4: memref<1x8x32xbf16, #tpu.memory_space<vmem>>, %arg5: memref<1x8x8xbf16, #tpu.memory_space<vmem>>, %arg6: memref<32x96xbf16, #tpu.memory_space<vmem>>, %arg7: memref<32x32xbf16, #tpu.memory_space<vmem>>, %arg8: memref<1x8x32xf32, #tpu.memory_space<vmem>>, %arg9: memref<8x32xbf16, #tpu.memory_space<vmem>>, %arg10: memref<8x1xf32, #tpu.memory_space<vmem>>, %arg11: memref<8x1xf32, #tpu.memory_space<vmem>>, %arg12: memref<8x32xf32, #tpu.memory_space<vmem>>) attributes {dimension_semantics = [#tpu.dimension_semantics<parallel>, #tpu.dimension_semantics<parallel>, #tpu.dimension_semantics<arbitrary>], iteration_bounds = array<i64: 2, 1, 1>, scalar_prefetch = 0 : i64, scratch_operands = 4 : i64, tpu.core_type = #tpu.core_type<tc>, window_params = [{transform_indices = @transform_0, window_bounds = array<i64: 1, 8, 32>}, {transform_indices = @transform_1, window_bounds = array<i64: 1, 8, 32>}, {transform_indices = @transform_2, window_bounds = array<i64: 1, 8, 8>}, {pipeline_mode = #tpu.pipeline_mode<synchronous>, transform_indices = @transform_3, window_bounds = array<i64: 32, 96>}, {pipeline_mode = #tpu.pipeline_mode<synchronous>, transform_indices = @transform_4, window_bounds = array<i64: 32, 32>}, {transform_indices = @transform_5, window_bounds = array<i64: 1, 8, 32>}]} {
    %c0 = arith.constant 0 : index
    %c0_0 = arith.constant 0 : index
    %0 = vector.load %arg6[%c0, %c0_0] : memref<32x96xbf16, #tpu.memory_space<vmem>>, vector<32x96xbf16>
    %c0_i32 = arith.constant 0 : i32
    %1 = arith.cmpi eq, %arg2, %c0_i32 : i32
    %2 = arith.extui %1 : i1 to i32
    %c0_i32_1 = arith.constant 0 : i32
    %3 = arith.cmpi ne, %2, %c0_i32_1 : i32
    scf.if %3 {
      %c0_30 = arith.constant 0 : index
      %c0_31 = arith.constant 0 : index
      %c0_32 = arith.constant 0 : index
      %44 = vector.load %arg3[%c0_30, %c0_31, %c0_32] : memref<1x8x32xbf16, #tpu.memory_space<vmem>>, vector<1x8x32xbf16>
      %45 = vector.shape_cast %44 : vector<1x8x32xbf16> to vector<8x32xbf16>
      %cst_33 = arith.constant dense<0.000000e+00> : vector<8x96xf32>
      %46 = tpu.matmul %45, %0, %cst_33 {dimension_numbers = #tpu.dot_dimension_numbers<[1], [0], [0], [1], [0, 0, 1, 1], [], []>} : vector<8x32xbf16>, vector<32x96xbf16>, vector<8x96xf32> -> vector<8x96xf32>
      %cst_34 = arith.constant 3.200000e+01 : f32
      %47 = math.sqrt %cst_34 : f32
      %cst_35 = arith.constant 1.000000e+00 : f32
      %48 = arith.divf %cst_35, %47 : f32
      %49 = vector.extract_strided_slice %46 {offsets = [0, 0], sizes = [8, 32], strides = [1, 1]} : vector<8x96xf32> to vector<8x32xf32>
      %50 = vector.broadcast %48 : f32 to vector<8x32xf32>
      %51 = arith.mulf %49, %50 : vector<8x32xf32>
      %52 = arith.truncf %51 : vector<8x32xf32> to vector<8x32xbf16>
      %c0_36 = arith.constant 0 : index
      %c0_37 = arith.constant 0 : index
      %53 = vector.load %arg9[%c0_36, %c0_37] : memref<8x32xbf16, #tpu.memory_space<vmem>>, vector<8x32xbf16>
      tpu.vector_store %arg9[%c0_36, %c0_37], %52 {strides = array<i32>} : memref<8x32xbf16, #tpu.memory_space<vmem>>, vector<8x32xbf16>,
      %cst_38 = arith.constant 0xFF800000 : f32
      %54 = vector.broadcast %cst_38 : f32 to vector<8x1xf32>
      %c0_39 = arith.constant 0 : index
      %c0_40 = arith.constant 0 : index
      %55 = vector.load %arg10[%c0_39, %c0_40] : memref<8x1xf32, #tpu.memory_space<vmem>>, vector<8x1xf32>
      tpu.vector_store %arg10[%c0_39, %c0_40], %54 {strides = array<i32>} : memref<8x1xf32, #tpu.memory_space<vmem>>, vector<8x1xf32>,
      %cst_41 = arith.constant 0.000000e+00 : f32
      %56 = vector.broadcast %cst_41 : f32 to vector<8x1xf32>
      %c0_42 = arith.constant 0 : index
      %c0_43 = arith.constant 0 : index
      %57 = vector.load %arg11[%c0_42, %c0_43] : memref<8x1xf32, #tpu.memory_space<vmem>>, vector<8x1xf32>
      tpu.vector_store %arg11[%c0_42, %c0_43], %56 {strides = array<i32>} : memref<8x1xf32, #tpu.memory_space<vmem>>, vector<8x1xf32>,
      %cst_44 = arith.constant 0.000000e+00 : f32
      %58 = vector.broadcast %cst_44 : f32 to vector<8x32xf32>
      %c0_45 = arith.constant 0 : index
      %c0_46 = arith.constant 0 : index
      %59 = vector.load %arg12[%c0_45, %c0_46] : memref<8x32xf32, #tpu.memory_space<vmem>>, vector<8x32xf32>
      tpu.vector_store %arg12[%c0_45, %c0_46], %58 {strides = array<i32>} : memref<8x32xf32, #tpu.memory_space<vmem>>, vector<8x32xf32>,
    } else {
    }
    %c0_2 = arith.constant 0 : index
    %c0_3 = arith.constant 0 : index
    %c0_4 = arith.constant 0 : index
    %4 = vector.load %arg4[%c0_2, %c0_3, %c0_4] : memref<1x8x32xbf16, #tpu.memory_space<vmem>>, vector<1x8x32xbf16>
    %5 = vector.shape_cast %4 : vector<1x8x32xbf16> to vector<8x32xbf16>
    %cst = arith.constant dense<0.000000e+00> : vector<8x96xf32>
    %6 = tpu.matmul %5, %0, %cst {dimension_numbers = #tpu.dot_dimension_numbers<[1], [0], [0], [1], [0, 0, 1, 1], [], []>} : vector<8x32xbf16>, vector<32x96xbf16>, vector<8x96xf32> -> vector<8x96xf32>
    %7 = vector.extract_strided_slice %6 {offsets = [0, 32], sizes = [8, 32], strides = [1, 1]} : vector<8x96xf32> to vector<8x32xf32>
    %8 = arith.truncf %7 : vector<8x32xf32> to vector<8x32xbf16>
    %9 = vector.extract_strided_slice %6 {offsets = [0, 64], sizes = [8, 32], strides = [1, 1]} : vector<8x96xf32> to vector<8x32xf32>
    %10 = arith.truncf %9 : vector<8x32xf32> to vector<8x32xbf16>
    %c0_5 = arith.constant 0 : index
    %c0_6 = arith.constant 0 : index
    %11 = vector.load %arg9[%c0_5, %c0_6] : memref<8x32xbf16, #tpu.memory_space<vmem>>, vector<8x32xbf16>
    %cst_7 = arith.constant dense<0.000000e+00> : vector<8x8xf32>
    %12 = tpu.matmul %11, %8, %cst_7 {dimension_numbers = #tpu.dot_dimension_numbers<[1], [1], [0], [0], [0, 0, 1, 0], [], []>} : vector<8x32xbf16>, vector<8x32xbf16>, vector<8x8xf32> -> vector<8x8xf32>
    %c0_8 = arith.constant 0 : index
    %c0_9 = arith.constant 0 : index
    %c0_10 = arith.constant 0 : index
    %13 = vector.load %arg5[%c0_8, %c0_9, %c0_10] : memref<1x8x8xbf16, #tpu.memory_space<vmem>>, vector<1x8x8xbf16>
    %14 = vector.shape_cast %13 : vector<1x8x8xbf16> to vector<8x8xbf16>
    %15 = arith.extf %14 : vector<8x8xbf16> to vector<8x8xf32>
    %16 = arith.addf %12, %15 : vector<8x8xf32>
    %c0_11 = arith.constant 0 : index
    %c0_12 = arith.constant 0 : index
    %17 = vector.load %arg10[%c0_11, %c0_12] : memref<8x1xf32, #tpu.memory_space<vmem>>, vector<8x1xf32>
    %cst_13 = arith.constant dense<0xFF800000> : vector<8xf32>
    %18 = vector.multi_reduction <maximumf>, %16, %cst_13 [1] : vector<8x8xf32> to vector<8xf32>
    %19 = vector.shape_cast %18 : vector<8xf32> to vector<8x1xf32>
    %20 = arith.maximumf %17, %19 : vector<8x1xf32>
    %c0_14 = arith.constant 0 : index
    %c0_15 = arith.constant 0 : index
    %21 = vector.load %arg10[%c0_14, %c0_15] : memref<8x1xf32, #tpu.memory_space<vmem>>, vector<8x1xf32>
    %22 = arith.subf %21, %20 : vector<8x1xf32>
    %23 = math.exp %22 : vector<8x1xf32>
    %24 = vector.broadcast %20 : vector<8x1xf32> to vector<8x8xf32>
    %25 = arith.subf %16, %24 : vector<8x8xf32>
    %26 = math.exp %25 : vector<8x8xf32>
    %c0_16 = arith.constant 0 : index
    %c0_17 = arith.constant 0 : index
    %27 = vector.load %arg11[%c0_16, %c0_17] : memref<8x1xf32, #tpu.memory_space<vmem>>, vector<8x1xf32>
    %28 = arith.mulf %23, %27 : vector<8x1xf32>
    %cst_18 = arith.constant dense<0.000000e+00> : vector<8xf32>
    %29 = vector.multi_reduction <add>, %26, %cst_18 [1] : vector<8x8xf32> to vector<8xf32>
    %30 = vector.shape_cast %29 : vector<8xf32> to vector<8x1xf32>
    %31 = arith.addf %28, %30 : vector<8x1xf32>
    %c0_19 = arith.constant 0 : index
    %c0_20 = arith.constant 0 : index
    %32 = vector.load %arg11[%c0_19, %c0_20] : memref<8x1xf32, #tpu.memory_space<vmem>>, vector<8x1xf32>
    tpu.vector_store %arg11[%c0_19, %c0_20], %31 {strides = array<i32>} : memref<8x1xf32, #tpu.memory_space<vmem>>, vector<8x1xf32>,
    %c0_21 = arith.constant 0 : index
    %c0_22 = arith.constant 0 : index
    %33 = vector.load %arg12[%c0_21, %c0_22] : memref<8x32xf32, #tpu.memory_space<vmem>>, vector<8x32xf32>
    %34 = vector.broadcast %23 : vector<8x1xf32> to vector<8x32xf32>
    %35 = arith.mulf %34, %33 : vector<8x32xf32>
    %36 = arith.truncf %26 : vector<8x8xf32> to vector<8x8xbf16>
    %cst_23 = arith.constant dense<0.000000e+00> : vector<8x32xf32>
    %37 = tpu.matmul %36, %10, %cst_23 {dimension_numbers = #tpu.dot_dimension_numbers<[1], [0], [0], [1], [0, 0, 1, 1], [], []>} : vector<8x8xbf16>, vector<8x32xbf16>, vector<8x32xf32> -> vector<8x32xf32>
    %38 = arith.addf %35, %37 : vector<8x32xf32>
    %c0_24 = arith.constant 0 : index
    %c0_25 = arith.constant 0 : index
    %39 = vector.load %arg12[%c0_24, %c0_25] : memref<8x32xf32, #tpu.memory_space<vmem>>, vector<8x32xf32>
    tpu.vector_store %arg12[%c0_24, %c0_25], %38 {strides = array<i32>} : memref<8x32xf32, #tpu.memory_space<vmem>>, vector<8x32xf32>,
    %c0_26 = arith.constant 0 : index
    %c0_27 = arith.constant 0 : index
    %40 = vector.load %arg10[%c0_26, %c0_27] : memref<8x1xf32, #tpu.memory_space<vmem>>, vector<8x1xf32>
    tpu.vector_store %arg10[%c0_26, %c0_27], %20 {strides = array<i32>} : memref<8x1xf32, #tpu.memory_space<vmem>>, vector<8x1xf32>,
    %c0_i32_28 = arith.constant 0 : i32
    %41 = arith.cmpi eq, %arg2, %c0_i32_28 : i32
    %42 = arith.extui %41 : i1 to i32
    %c0_i32_29 = arith.constant 0 : i32
    %43 = arith.cmpi ne, %42, %c0_i32_29 : i32
    scf.if %43 {
      %c0_30 = arith.constant 0 : index
      %c0_31 = arith.constant 0 : index
      %44 = vector.load %arg12[%c0_30, %c0_31] : memref<8x32xf32, #tpu.memory_space<vmem>>, vector<8x32xf32>
      %c0_32 = arith.constant 0 : index
      %c0_33 = arith.constant 0 : index
      %45 = vector.load %arg11[%c0_32, %c0_33] : memref<8x1xf32, #tpu.memory_space<vmem>>, vector<8x1xf32>
      %46 = tpu.reciprocal %45 {approx = true} : vector<8x1xf32> -> vector<8x1xf32>
      %47 = vector.broadcast %46 : vector<8x1xf32> to vector<8x32xf32>
      %48 = arith.mulf %44, %47 : vector<8x32xf32>
      %49 = arith.truncf %48 : vector<8x32xf32> to vector<8x32xbf16>
      %c0_34 = arith.constant 0 : index
      %c0_35 = arith.constant 0 : index
      %50 = vector.load %arg7[%c0_34, %c0_35] : memref<32x32xbf16, #tpu.memory_space<vmem>>, vector<32x32xbf16>
      %cst_36 = arith.constant dense<0.000000e+00> : vector<8x32xf32>
      %51 = tpu.matmul %49, %50, %cst_36 {dimension_numbers = #tpu.dot_dimension_numbers<[1], [0], [0], [1], [0, 0, 1, 1], [], []>} : vector<8x32xbf16>, vector<32x32xbf16>, vector<8x32xf32> -> vector<8x32xf32>
      %c0_37 = arith.constant 0 : index
      %c0_38 = arith.constant 0 : index
      %c0_39 = arith.constant 0 : index
      %52 = vector.load %arg8[%c0_37, %c0_38, %c0_39] : memref<1x8x32xf32, #tpu.memory_space<vmem>>, vector<1x8x32xf32>
      %53 = vector.shape_cast %52 : vector<1x8x32xf32> to vector<8x32xf32>
      %54 = vector.shape_cast %51 : vector<8x32xf32> to vector<1x8x32xf32>
      tpu.vector_store %arg8[%c0_37, %c0_38, %c0_39], %54 {strides = array<i32>} : memref<1x8x32xf32, #tpu.memory_space<vmem>>, vector<1x8x32xf32>,
    } else {
    }
    return
  }
  func.func @transform_0(%arg0: i32, %arg1: i32, %arg2: i32) -> (i32, i32, i32) {
    %c0_i32 = arith.constant 0 : i32
    %c0_i32_0 = arith.constant 0 : i32
    return %arg0, %arg1, %c0_i32 : i32, i32, i32
  }
  func.func @transform_1(%arg0: i32, %arg1: i32, %arg2: i32) -> (i32, i32, i32) {
    %c0_i32 = arith.constant 0 : i32
    %c0_i32_0 = arith.constant 0 : i32
    return %arg0, %arg2, %c0_i32 : i32, i32, i32
  }
  func.func @transform_2(%arg0: i32, %arg1: i32, %arg2: i32) -> (i32, i32, i32) {
    %c0_i32 = arith.constant 0 : i32
    return %arg0, %arg1, %arg2 : i32, i32, i32
  }
  func.func @transform_3(%arg0: i32, %arg1: i32, %arg2: i32) -> (i32, i32) {
    %c0_i32 = arith.constant 0 : i32
    %c0_i32_0 = arith.constant 0 : i32
    %c0_i32_1 = arith.constant 0 : i32
    return %c0_i32, %c0_i32_0 : i32, i32
  }
  func.func @transform_4(%arg0: i32, %arg1: i32, %arg2: i32) -> (i32, i32) {
    %c0_i32 = arith.constant 0 : i32
    %c0_i32_0 = arith.constant 0 : i32
    %c0_i32_1 = arith.constant 0 : i32
    return %c0_i32, %c0_i32_0 : i32, i32
  }
  func.func @transform_5(%arg0: i32, %arg1: i32, %arg2: i32) -> (i32, i32, i32) {
    %c0_i32 = arith.constant 0 : i32
    %c0_i32_0 = arith.constant 0 : i32
    return %arg0, %arg1, %c0_i32 : i32, i32, i32
  }
}

</mosaic_0001>

<bundles_post_ra>
// kernel: tpu_custom_call.1
= control target key start
LH: loop header
LB: loop body
LE: loop exit
PB: predicated region body
PF: predicated region fallthrough
CT: control target
= control target key end

     0   :  { %s1714_s0 = inlined_call_operand.hbm [shape: bf16[2,8,32], index: 0, kind: input, shape index: {}]   ;;  %s1715_s1 = inlined_call_operand.hbm [shape: bf16[2,8,32], index: 1, kind: input, shape index: {}]   ;;  %s1716_s2 = inlined_call_operand.hbm [shape: bf16[2,8,8], index: 2, kind: input, shape index: {}]   ;;  %s1717_s3 = inlined_call_operand.hbm [shape: bf16[32,96], index: 3, kind: input, shape index: {}]   ;;  %s1718_s4 = inlined_call_operand.hbm [shape: bf16[32,32], index: 4, kind: input, shape index: {}]   ;;  %s1719_s5 = inlined_call_operand.hbm [shape: f32[2,8,32], index: 5, kind: output, shape index: {}]  }
   0x1   :  { %1736 = sst [smem:[#allocation23_spill]] %s1715_s1 }
   0x2   :  { %1737 = sst [smem:[#allocation24_spill]] %s1717_s3 }
   0x3   :  { %1738 = sst [smem:[#allocation25_spill]] %s1718_s4 }
   0x4   :  { %10 = vsyncpa [#allocation7], 0 }
   0x5   :  { %12 = vsyncpa [#allocation7 + $0x1], 0 }
   0x6   :  { %13 = vsyncpa [#allocation10], 0 }
   0x7   :  { %15 = vsyncpa [#allocation10 + $0x1], 0 }
   0x8   :  { %16 = vsyncpa [#allocation13], 0 }
   0x9   :  { %17 = vsyncpa [#allocation8], 0 }
   0xa   :  { %19 = vsyncpa [#allocation8 + $0x1], 0  ;;  %s1356_s18 = smov 0   ;;  %s1358_s19 = smov 0  }
   0xb   :  { %s1360_s20 = smov 0   ;;  %s1362_s21 = smov 0  }
   0xc   :  { %s1364_s22 = smov 0   ;;  %s1366_s23 = smov 0  }
   0xd LB: > { %1739 = sst [smem:[#allocation20_spill]] %s1306_s22  ;;  %s1387_s24 = sadd.s32 4294967295, %s1310_s23   ;;  %s1310_s23 = sphi %s1366_s23, %s25_s23   ;;  %s1306_s22 = sphi %s1364_s22, %s1771_s22   ;;  %s1302_s21 = sphi %s1362_s21, %s1770_s21   ;;  %s1298_s20 = sphi %s1360_s20, %s1774_s20   ;;  %s1294_s19 = sphi %s1358_s19, %s1773_s19   ;;  %s1290_s18 = sphi %s1356_s18, %s1772_s18  }
   0xe   : > { %s879_s25 = sadd.s32 4294967294, %s1310_s23   ;;  %p66_p0 = scmp.ne.s32.totalorder %s1294_s19, %s1290_s18 }
   0xf   : > { %p1720_p1 = scmp.eq.s32.totalorder %s1387_s24, 0  ;;  %p198_p3 = scmp.eq.s32.totalorder %s879_s25, 1 }
  0x10   : > { %p880_p5 = scmp.ge.s32.totalorder %s1310_s23, 1  ;;  %p205_p7 = scmp.lt.s32.totalorder %s1310_s23, 3 }
  0x11   : > { %p1396_p4 = por %p1720_p1, %p66_p0  ;;  %p1401_p6 = por %p198_p3, %p66_p0 }
  0x12   : > { %p1406_p8 = pnand %p880_p5, %p205_p7  ;;  %s1312_s29 = smov [#allocation12]  }
  0x13   : > { %s1740_s26 = scalar_select %p1396_p4, 1, 0 }
  0x14   : > { %s1741_s27 = scalar_select %p1401_p6, 1, 0 }
  0x15   : > { %s1742_s28 = scalar_select %p1406_p8, 1, 0 }
  0x16   : > { %s217_s30 = sshll.u32 %s1312_s29, 4  ;;  %p977_p9 = pneg %p1406_p8  ;;  %s218_s30 = int_to_ptr.vmem [resolvable:$true] %s217_s30 }
  0x17   : > { %s44_s7 = sadd.s32 1, %s1306_s22  ;;  %s1744_s3 = sld [smem:[#allocation24_spill]] }
  0x18   : > { %p1415_p11 = pnand %p977_p9, %p1720_p1 }
  0x1a   : > { %s1743_s6 = scalar_select %p1415_p11, 1, 0 }
  0x1b   : > { %p1728_p13 = pneg %p1415_p11 }
  0x1d   : > { %s1074_s10 = scalar_lea.hbm %s1744_s3, 256 }
  0x1e   : > { %p1075_p12 = scmp.ne.s32.totalorder %s1744_s3, %s1074_s10  ;;  %p1081_p5 = scmp.lt.u32.totalorder %s1074_s10, %s1744_s3 }
  0x20   : > { %p1077_p0 = pnand %p1728_p13, %p1075_p12 }
  0x22   : > { %p1078_p3 = pneg %p1077_p0 }
  0x24   : > { %p1083_p7 = pnand %p1081_p5, %p1078_p3 }
  0x26   : > { %1086 = shalt.err (!%p1083_p7)
}
  0x27   : > { %s1087_s15 = scalar_lea.vmem %s218_s30, 256  ;;  %p1095_p2 = scmp.lt.s32.totalorder %s218_s30, %s218_s30 }
  0x28   : > { %p1088_p9 = scmp.ne.s32.totalorder %s218_s30, %s1087_s15  ;;  %p1096_p6 = scmp.lt.s32.totalorder %s1087_s15, %s1087_s15 }
  0x2a   : > { %p1090_p10 = pnand %p1088_p9, %p1728_p13  ;;  %p1097_p4 = por %p1096_p6, %p1095_p2 }
  0x2c   : > { %p1091_p1 = pneg %p1090_p10 }
  0x2e   : > { %p1098_p8 = pnand %p1097_p4, %p1091_p1 }
  0x30   : > { %1101 = shalt.err (!%p1098_p8)
}
  0x31   : > { %s1724_s16 = smov 64   ;;  %s1725_s17 = smov 4  }
  0x32   : > { %980 = dma.hbm_to_vmem [thread:$0]  (!%p1415_p11), %s1744_s3, 256, %s218_s30, [#allocation13], %s1724_s16, %s1724_s16, %s1725_s17  }
  0x33   : > { %p46_p1 = scmp.ge.s32.totalorder %s44_s7, 2  ;;  %s53_s8 = sadd.s32 1, %s1298_s20 }
  0x34   : > { %p60_p2 = scmp.ne.s32.totalorder %s1298_s20, %s1294_s19  ;;  %p61_p4 = scmp.eq.s32.totalorder %s1310_s23, 0 }
  0x35   : > { %s1776_s7 = smov (%p46_p1, %s44_s7), 0  ;;  %p1746_p8 = scmp.eq.s32.totalorder %s1387_s24, 1 }
  0x36   : > { %1745 = sst [smem:[#allocation21_spill]] %s1776_s7  ;;  %p62_p6 = por %p61_p4, %p60_p2 }
  0x37   : > { %p1453_p10 = por %p1746_p8, %p60_p2  ;;  %s48_s10 = ssub.s32 %s1306_s22, %s1776_s7 }
  0x38   : > { %p1000_p12 = scmp.lt.s32.totalorder %s1310_s23, 2  ;;  %p51_p0 = scmp.eq.s32.totalorder %s48_s10, 0 }
  0x39   : > { %s1747_s9 = scalar_select %p1453_p10, 1, 0 }
  0x3a   : > { %s1723_s11 = sand.u32 1, %s1298_s20   ;;  %s1466_s12 = sshll.u32 %s1306_s22, 6 }
  0x3b   : > { %s1463_s30 = sshll.u32 %s1723_s11, 2  ;;  %p1471_p3 = pnand %p1000_p12, %p62_p6 }
  0x3c   : > { %s1469_s13 = scalar_select %p51_p0, %s1298_s20, %s53_s8  }
  0x3d   : > { %s1749_s14 = scalar_select %p1471_p3, 1, 0 }
  0x3e   : > { %1748 = sst [smem:[#allocation22_spill]] %s1469_s13  ;;  %s263_s15 = sand.u32 1, %s1310_s23  }
  0x3f   : > { %s1750_s1 = sld [smem:[#allocation23_spill]]  ;;  %s267_s11 = scalar_lea.vmem [#allocation9], %s1463_s30 }
  0x40   : > { %s275_s16 = sshll.u32 %s267_s11, 4  ;;  %s1315_s8 = smov [#allocation14]   ;;  %s1483_s16 = int_to_ptr.vmem [resolvable:$true] %s275_s16 }
  0x41   : > { %s1485_s17 = sshll.u32 %s1315_s8, 4  ;;  %s1487_s3 = scalar_lea.sflag [#allocation10], %s263_s15  ;;  %s231_s17 = int_to_ptr.vmem [resolvable:$true] %s1485_s17 }
  0x42   : > { %p1493_p7 = pneg %p1471_p3 }
  0x44   : > { %s1751_s25 = scalar_select %p1493_p7, 1, 0 }
  0x45   : > { %s1480_s10 = scalar_lea.hbm %s1750_s1, %s1466_s12  ;;  %s1107_s22 = scalar_lea.hbm %s1750_s1, 128 }
  0x46   : > { %s1102_s7 = scalar_lea.hbm %s1480_s10, 64  ;;  %p1108_p2 = scmp.lt.u32.totalorder %s1480_s10, %s1750_s1 }
  0x47   : > { %p1103_p5 = scmp.ne.s32.totalorder %s1480_s10, %s1102_s7  ;;  %p1109_p4 = scmp.lt.u32.totalorder %s1107_s22, %s1102_s7 }
  0x48   : > { %p1111_p8 = scmp.lt.u32.totalorder %s1102_s7, %s1480_s10 }
  0x49   : > { %p1105_p9 = pnand %p1493_p7, %p1103_p5  ;;  %p1110_p6 = por %p1109_p4, %p1108_p2 }
  0x4b   : > { %p1106_p1 = pneg %p1105_p9  ;;  %p1112_p12 = por %p1111_p8, %p1110_p6 }
  0x4d   : > { %p1113_p0 = pnand %p1112_p12, %p1106_p1 }
  0x4f   : > { %1116 = shalt.err (!%p1113_p0)
}
  0x50   : > { %s1117_s15 = scalar_lea.vmem %s1483_s16, 64  ;;  %s1316_s29 = smov [#allocation9]  }
  0x51   : > { %p1118_p5 = scmp.ne.s32.totalorder %s1483_s16, %s1117_s15  ;;  %s1122_s11 = sshll.u32 %s1316_s29, 4  ;;  %s1123_s11 = int_to_ptr.vmem [resolvable:$false] %s1122_s11 }
  0x52   : > { %s1124_s13 = scalar_lea.vmem %s1123_s11, 128  ;;  %p1125_p10 = scmp.lt.s32.totalorder %s1483_s16, %s1123_s11 }
  0x53   : > { %p1120_p9 = pnand %p1118_p5, %p1493_p7  ;;  %p1126_p11 = scmp.lt.s32.totalorder %s1124_s13, %s1117_s15 }
  0x55   : > { %p1121_p13 = pneg %p1120_p9  ;;  %p1127_p2 = por %p1126_p11, %p1125_p10 }
  0x57   : > { %p1128_p4 = pnand %p1127_p2, %p1121_p13 }
  0x59   : > { %1131 = shalt.err (!%p1128_p4)
}
  0x5a   : > { %990 = dma.hbm_to_vmem [thread:$0]  (!%p1471_p3), %s1480_s10, 64, %s1483_s16, %s1487_s3  }
  0x5b   : > { %s1752_s4 = sld [smem:[#allocation25_spill]]  ;;  %p1753_p11 = scmp.ne.s32.totalorder %s1743_s6, 0 }
  0x5d   : > { %p1754_p13 = pneg %p1753_p11 }
  0x61   : > { %s1132_s8 = scalar_lea.hbm %s1752_s4, 256 }
  0x62   : > { %p1133_p1 = scmp.ne.s32.totalorder %s1752_s4, %s1132_s8  ;;  %p1139_p8 = scmp.lt.u32.totalorder %s1132_s8, %s1752_s4 }
  0x64   : > { %p1135_p10 = pnand %p1133_p1, %p1754_p13 }
  0x66   : > { %p1136_p6 = pneg %p1135_p10 }
  0x68   : > { %p1141_p12 = pnand %p1139_p8, %p1136_p6 }
  0x6a   : > { %1144 = shalt.err (!%p1141_p12)
}
  0x6b   : > { %s1145_s16 = scalar_lea.vmem %s231_s17, 256  ;;  %p1755_p5 = pmov %p1754_p13 }
  0x6c   : > { %p1146_p0 = scmp.ne.s32.totalorder %s231_s17, %s1145_s16  ;;  %p1153_p4 = scmp.lt.s32.totalorder %s231_s17, %s231_s17 }
  0x6d   : > { %p1154_p3 = scmp.lt.s32.totalorder %s1145_s16, %s1145_s16 }
  0x6e   : > { %p1148_p9 = pnand %p1146_p0, %p1755_p5 }
  0x6f   : > { %p1155_p7 = por %p1154_p3, %p1153_p4 }
  0x70   : > { %p1149_p2 = pneg %p1148_p9 }
  0x72   : > { %p1156_p1 = pnand %p1155_p7, %p1149_p2 }
  0x74   : > { %1159 = shalt.err (!%p1156_p1)
}
  0x75   : > { %s1756_s1 = smov 4   ;;  %s1757_s10 = smov 64  }
  0x76   : > { %983 = dma.hbm_to_vmem [thread:$0]  (!%p1753_p11), %s1752_s4, 256, %s231_s17, [#allocation13], %s1757_s10, %s1757_s10, %s1756_s1  }
  0x77   : > { %s1545_s29 = scalar_lea.hbm %s1714_s0, %s1466_s12  ;;  %s248_s6 = scalar_lea.vmem [#allocation6], %s1463_s30 }
  0x78   : > { %s256_s15 = sshll.u32 %s248_s6, 4  ;;  %s1554_s13 = scalar_lea.hbm %s1716_s2, %s1466_s12  ;;  %s1548_s15 = int_to_ptr.vmem [resolvable:$true] %s256_s15 }
  0x79   : > { %s1758_s22 = sand.u32 1, %s1298_s20   ;;  %s1160_s1 = scalar_lea.hbm %s1545_s29, 64 }
  0x7a   : > { %s245_s17 = scalar_lea.sflag [#allocation7], %s1758_s22  ;;  %p1161_p3 = scmp.ne.s32.totalorder %s1545_s29, %s1160_s1 }
  0x7b   : > { %p1759_p7 = scmp.ne.s32.totalorder %s1751_s25, 0  ;;  %s1165_s8 = scalar_lea.hbm %s1714_s0, 128 }
  0x7c   : > { %p1166_p10 = scmp.lt.u32.totalorder %s1545_s29, %s1714_s0  ;;  %p1167_p6 = scmp.lt.u32.totalorder %s1165_s8, %s1160_s1 }
  0x7d   : > { %p1163_p11 = pnand %p1161_p3, %p1759_p7  ;;  %p1169_p12 = scmp.lt.u32.totalorder %s1160_s1, %s1545_s29 }
  0x7e   : > { %p1168_p8 = por %p1167_p6, %p1166_p10 }
  0x7f   : > { %p1164_p13 = pneg %p1163_p11 }
  0x80   : > { %p1170_p0 = por %p1169_p12, %p1168_p8 }
  0x82   : > { %p1171_p5 = pnand %p1170_p0, %p1164_p13 }
  0x84   : > { %1174 = shalt.err (!%p1171_p5)
}
  0x85   : > { %s1175_s12 = scalar_lea.vmem %s1548_s15, 64  ;;  %s1317_s11 = smov [#allocation6]  }
  0x86   : > { %p1176_p9 = scmp.ne.s32.totalorder %s1548_s15, %s1175_s12  ;;  %s1180_s16 = sshll.u32 %s1317_s11, 4  ;;  %s1181_s16 = int_to_ptr.vmem [resolvable:$false] %s1180_s16 }
  0x87   : > { %s1182_s4 = scalar_lea.vmem %s1181_s16, 128  ;;  %p1183_p1 = scmp.lt.s32.totalorder %s1548_s15, %s1181_s16 }
  0x88   : > { %p1178_p2 = pnand %p1176_p9, %p1759_p7  ;;  %p1184_p3 = scmp.lt.s32.totalorder %s1182_s4, %s1175_s12 }
  0x8a   : > { %p1179_p4 = pneg %p1178_p2  ;;  %p1185_p11 = por %p1184_p3, %p1183_p1 }
  0x8c   : > { %p1186_p10 = pnand %p1185_p11, %p1179_p4 }
  0x8e   : > { %1189 = shalt.err (!%p1186_p10)
}
  0x8f   : > { %p1760_p13 = scmp.ne.s32.totalorder %s1749_s14, 0  ;;  %s286_s22 = scalar_lea.vmem [#allocation11], %s1463_s30 }
  0x90   : > { %s295_s1 = sshll.u32 %s286_s22, 4  ;;  %s1190_s10 = scalar_lea.hbm %s1554_s13, 64  ;;  %s296_s1 = int_to_ptr.vmem [resolvable:$true] %s295_s1 }
  0x91   : > { %987 = dma.hbm_to_vmem [thread:$0]  (!%p1760_p13), %s1545_s29, 64, %s1548_s15, %s245_s17  }
  0x92   : > { %p1191_p6 = scmp.ne.s32.totalorder %s1554_s13, %s1190_s10  ;;  %s1195_s6 = scalar_lea.hbm %s1716_s2, 128 }
  0x93   : > { %p1196_p0 = scmp.lt.u32.totalorder %s1554_s13, %s1716_s2  ;;  %p1197_p5 = scmp.lt.u32.totalorder %s1195_s6, %s1190_s10 }
  0x94   : > { %p1193_p8 = pnand %p1191_p6, %p1759_p7  ;;  %p1199_p2 = scmp.lt.u32.totalorder %s1190_s10, %s1554_s13 }
  0x95   : > { %p1198_p9 = por %p1197_p5, %p1196_p0 }
  0x96   : > { %p1194_p12 = pneg %p1193_p8 }
  0x97   : > { %p1200_p4 = por %p1199_p2, %p1198_p9 }
  0x99   : > { %p1201_p1 = pnand %p1200_p4, %p1194_p12 }
  0x9b   : > { %1204 = shalt.err (!%p1201_p1)
}
  0x9c   : > { %s1205_s30 = scalar_lea.vmem %s296_s1, 64  ;;  %s1318_s29 = smov [#allocation11]  }
  0x9d   : > { %p1206_p3 = scmp.ne.s32.totalorder %s296_s1, %s1205_s30  ;;  %s1210_s15 = sshll.u32 %s1318_s29, 4  ;;  %s1211_s15 = int_to_ptr.vmem [resolvable:$false] %s1210_s15 }
  0x9e   : > { %s1212_s17 = scalar_lea.vmem %s1211_s15, 128  ;;  %p1213_p6 = scmp.lt.s32.totalorder %s296_s1, %s1211_s15 }
  0x9f   : > { %p1208_p11 = pnand %p1206_p3, %p1759_p7  ;;  %p1214_p8 = scmp.lt.s32.totalorder %s1212_s17, %s1205_s30 }
  0xa1   : > { %p1209_p10 = pneg %p1208_p11  ;;  %p1215_p13 = por %p1214_p8, %p1213_p6 }
  0xa3   : > { %p1216_p0 = pnand %p1215_p13, %p1209_p10 }
  0xa5   : > { %1219 = shalt.err (!%p1216_p0)
}
  0xa6   : > { %p1761_p5 = scmp.ne.s32.totalorder %s1749_s14, 0  ;;  %p1762_p12 = scmp.ne.s32.totalorder %s1742_s28, 0 }
  0xa7   : > { %s1601_s25 = sand.u32 (!%p1762_p12), 1, %s1294_s19   ;;  %p1763_p7 = scmp.ne.s32.totalorder (!%p1762_p12), %s1740_s26, 0 }
  0xa8   : > { %993 = dma.hbm_to_vmem [thread:$0]  (!%p1761_p5), %s1554_s13, 64, %s296_s1, %s1487_s3  }
  0xa9   : > { %304 = sbr.rel (%p1762_p12) target bundleno = 1555 (0x613), region = 40  ;;  %s1604_s16 = sshll.u32 (!%p1762_p12), %s1601_s25, 2 }
  0xaa   : > { %s307_s4 = scalar_lea.sflag (!%p1762_p12), [#allocation7], %s1601_s25  ;;  %s310_s22 = scalar_lea.vmem (!%p1762_p12), [#allocation6], %s1604_s16 }
  0xb0   : > { %1273 = dma.done.wait (%p1763_p7), %s307_s4, 64  }
  0xb1   : > { %1275 = vsyncadd (%p1763_p7), %s307_s4, 4294967232  ;;  %s315_s3 = sand.u32 1, %s1387_s24   ;;  %s319_s14 = scalar_lea.vmem [#allocation9], %s1604_s16 }
  0xb2   : > { %s316_s28 = scalar_lea.sflag [#allocation10], %s315_s3 }
  0xb3   : > { %1277 = dma.done.wait (%p1763_p7), %s316_s28, 128  }
  0xb4   : > { %1279 = vsyncadd (%p1763_p7), %s316_s28, 4294967168  ;;  %s328_s13 = scalar_lea.vmem [#allocation11], %s1604_s16  ;;  %p1764_p13 = scmp.eq.s32.totalorder %s1387_s24, 0 }
  0xb6   : > { %1281 = dma.done.wait (%p1764_p13), [#allocation13], 512   ;;  %p1765_p9 = pmov %p1764_p13 }
  0xb7   : > { %vm395_vm0 = vcmask 261120   ;;  %v1319_v0 = vmov 0.0   ;;  %vm1320_vm1 = vmmov 0   ;;  %v1064_v1 = vld [vmem:[#allocation12] sm:$0xff]   ;;  %v1065_v2 = vld [vmem:[#allocation12 + $0x8] sm:$0xff]   ;;  %vm441_vm2 = vcmask 257024  }
  0xb8   : > { %1283 = vsyncadd (%p1765_p9), [#allocation13], 4294966784  ;;  %933 = vmatprep.subr.bf16.mxu1 %v1319_v0  ;;  %937 = vmatprep.mubr.msk.bf16.mxu1 %vm1320_vm1, %v1319_v0  ;;  %446 = vst.msk [vmem:[#allocation5] sm:$0xff] %vm395_vm0, %v1319_v0  ;;  %v447_v3 = vld [vmem:[%s319_s14] sm:$0xf]  ;;  %s1321_s24 = smov 96  }
  0xb9   : > { %925 = vmatprep.subr.bf16.mxu0 %v1319_v0  ;;  %929 = vmatprep.mubr.msk.bf16.mxu0 %vm1320_vm1, %v1319_v0  ;;  %v382_v4 = vld [vmem:[%s310_s22] sm:$0xf]  ;;  %vm443_vm3 = vcmask 7168   ;;  %v1322_v19 = vmov -inf   ;;  %v506_v20 = vld [vmem:[%s328_s13] sm:$0xf] }
  0xba   : > { %934 = vmatpush3.bf16.msra.mxu1 %v1064_v1  ;;  %926 = vmatpush3.bf16.msra.mxu0 %v1064_v1  ;;  %444 = vst.msk [vmem:[#allocation3] sm:$0xff] %vm443_vm3, %v1322_v19  ;;  %445 = vst.msk [vmem:[#allocation4] sm:$0xff] %vm443_vm3, %v1319_v0  ;;  %v507_v21 = vunpack.c.l.bf16 %v506_v20  ;;  %vm558_vm4 = vcmask 64512   ;;  %v1323_v28 = vmov 0   ;;  %s1324_s26 = smov 64   ;;  %vm595_vm5 = vcmask 1043456  }
  0xbb   : > { %935 = vmatprep.subr.bf16.mxu1 %v1319_v0  ;;  %927 = vmatprep.subr.bf16.mxu0 %v1319_v0  ;;  %v1066_v43 = vld [vmem:[#allocation14] sm:$0xff]   ;;  %v1067_v50 = vld [vmem:[#allocation14 + $0x8] sm:$0xff]   ;;  %s896_s1 = sshll.u32 %s1601_s25, 3  ;;  %s909_s10 = sshll.u32 %s1302_s21, 7 }
  0xbc   : > { %1062 = vset.pattern.permute.xlu1 %v1323_v28  ;;  %1063 = vset.pattern.permute.xlu0 %v1323_v28  ;;  %s372_s7 = scalar_lea.vmem [#allocation15], %s896_s1  ;;  %s1664_s11 = scalar_lea.hbm %s1719_s5, %s909_s10 }
  0xbd   : > { %s730_s8 = sshll.u32 %s372_s7, 4  ;;  %s716_s30 = scalar_lea.sflag [#allocation8], %s1601_s25  ;;  %s1666_s8 = int_to_ptr.vmem [resolvable:$true] %s730_s8 }
  0xbe   : > { %936 = vmatpush3.bf16.msra.mxu1 %v1065_v2  ;;  %928 = vmatpush3.bf16.msra.mxu0 %v1065_v2  ;;  %s1220_s29 = scalar_lea.vmem %s1666_s8, 128  ;;  %p1766_p4 = scmp.ne.s32.totalorder %s1747_s9, 0 }
  0xbf   : > { %941 = vmatprep.subr.bf16.mxu0 %v1319_v0  ;;  %947 = vmatprep.subr.bf16.mxu1 %v1319_v0  ;;  %v582_v51 = vld [vmem:[#allocation5] sm:$0xff]  ;;  %p1221_p2 = scmp.ne.s32.totalorder %s1666_s8, %s1220_s29  ;;  %s1325_s21 = smov [#allocation15]  }
  0xc0   : > { %s1224_s15 = sshll.u32 %s1325_s21, 4  ;;  %s1225_s15 = int_to_ptr.vmem [resolvable:$false] %s1224_s15 }
  0xc1   : > { %938 = vmatmul.mubr.msk.bf16.vlgmr.msra.gmra.mrb[0].mxu1 %vm395_vm0, %v447_v3  ;;  %930 = vmatmul.mubr.msk.bf16.vlgmr.msra.gmra.mrb[0].mxu0 %vm395_vm0, %v382_v4  ;;  %v557_v29 = vld [vmem:[#allocation3] sm:$0xff]  ;;  %v574_v44 = vld [vmem:[#allocation4] sm:$0xff]  ;;  %p1222_p1 = pnand %p1221_p2, %p1766_p4  ;;  %s1226_s17 = scalar_lea.vmem %s1225_s15, 256 }
  0xc2   : > { %943 = vmatprep.mubr.msk.bf16.mxu0 %vm1320_vm1, %v1319_v0  ;;  %949 = vmatprep.mubr.msk.bf16.mxu1 %vm1320_vm1, %v1319_v0  ;;  %p1227_p11 = scmp.lt.s32.totalorder %s1666_s8, %s1225_s15  ;;  %p1228_p10 = scmp.lt.s32.totalorder %s1226_s17, %s1220_s29 }
  0xc3   : > { %p1223_p3 = pneg %p1222_p1 }
  0xc4   : > { %p1229_p6 = por %p1228_p10, %p1227_p11 }
  0xc6   : > { %p1230_p8 = pnand %p1229_p6, %p1223_p3 }
 0x194   : > { %v498_v5 = vpop.f32.mrb[0].mxu1  ;;  %v433_v6 = vpop.f32.mrb[0].mxu0 }
 0x195   : > { %v504_v7 = vpack.c.bf16 %v498_v5, %v498_v5  ;;  %v939_v8 = vpop.f32.mrb[1].mxu1  ;;  %v439_v9 = vmul.f32 0.17677669, %v433_v6  ;;  %v931_v10 = vpop.f32.mrb[1].mxu0 }
 0x196   : > { %v501_v11 = vpop.f32.mrb[2].mxu1  ;;  %v436_v12 = vpop.f32.mrb[2].mxu0 }
 0x197   : > { %509 = vrot.lane.b32.xlu0 %v504_v7, %s1321_s24  ;;  %v940_v13 = vpop.f32.mrb[3].mxu1  ;;  %v440_v14 = vpack.c.bf16 %v439_v9, %v439_v9  ;;  %v932_v15 = vpop.f32.mrb[3].mxu0 }
 0x199   : > { %442 = vst.msk [vmem:[#allocation2] sm:$0xf] %vm441_vm2, %v440_v14 }
 0x1a0   : > { %v505_v18 = vld [vmem:[#allocation2] sm:$0xf] }
 0x209   : > { %v510_v16 = vpop.permute.xlu0 %509 }
 0x20a   : > { %v515_v17 = vsel %vm395_vm0, %v510_v16, 0 }
 0x20b   : > { %942 = vmatpush3.bf16.xpose.msra.mxu0 %v515_v17 }
 0x20c   : > { %953 = vmatprep.subr.bf16.mxu0 %v1319_v0 }
 0x212   : > { %944 = vmatmul.mubr.msk.bf16.vlgmr.msra.gmra.mrb[4].mxu0 %vm395_vm0, %v505_v18 }
 0x213   : > { %957 = vmatprep.mubr.msk.bf16.mxu0 %vm1320_vm1, %v1319_v0  ;;  %954 = vmatpush3.bf16.msra.mxu0 %v1066_v43 }
 0x214   : > { %955 = vmatprep.subr.bf16.mxu0 %v1319_v0 }
 0x217   : > { %956 = vmatpush3.bf16.msra.mxu0 %v1067_v50 }
 0x2e5   : > { %v551_v22 = vpop.f32.mrb[4].mxu0 }
 0x2e6   : > { %v552_v23 = vadd.f32 %v551_v22, %v507_v21  ;;  %v945_v24 = vpop.f32.mrb[5].mxu0 }
 0x2e7   : > { %v554_v25 = vpop.f32.mrb[6].mxu0 }
 0x2e8   : > { %v946_v26 = vpop.f32.mrb[7].mxu0  ;;  %v559_v27 = vsel %vm558_vm4, %v552_v23, -inf }
 0x2e9   : > { %560 = vmax.xlane.f32.xlu0 %v559_v27 }
 0x376   : > { %v561_v30 = vpop.xlane.xlu0 %560 }
 0x377   : > { %v562_v31 = vmax.f32 %v557_v29, %v561_v30 }
 0x379   : > { %v563_v32 = vsub.f32 %v557_v29, %v562_v31  ;;  %641 = vst.msk [vmem:[#allocation3] sm:$0xff] %vm443_vm3, %v562_v31  ;;  %568 = vperm.xlu1 %1062, %v562_v31  }
 0x37b   : > { %v564_v33 = vmul.f32 1.442695, %v563_v32 }
 0x37d   : > { %1068 = vpow2.f32 %v564_v33  ;;  %590 = vrot.lane.b32.xlu1 %v504_v7, %s1324_s26 }
 0x387   : > { %v1069_v34 = vpop.eup %1068 }
 0x388   : > { %585 = vperm.xlu0 %1063, %v1069_v34   ;;  %v575_v45 = vmul.f32 %v1069_v34, %v574_v44 }
 0x3f8   : > { %v569_v35 = vpop.permute.xlu1 %568 }
 0x3f9   : > { %v571_v36 = vsub.f32 %v552_v23, %v569_v35 }
 0x3fb   : > { %v572_v37 = vmul.f32 1.442695, %v571_v36 }
 0x3fc   : > { %v591_v38 = vpop.permute.xlu1 %590 }
 0x3fd   : > { %1070 = vpow2.f32 %v572_v37  ;;  %v597_v39 = vsel %vm595_vm5, %v591_v38, 0 }
 0x3fe   : > { %948 = vmatpush3.bf16.msra.mxu1 %v597_v39 }
 0x407   : > { %v1071_v40 = vpop.eup %1070  ;;  %v586_v52 = vpop.permute.xlu0 %585 }
 0x408   : > { %v576_v41 = vsel %vm558_vm4, %v1071_v40, 0.0  ;;  %v589_v42 = vpack.c.bf16 %v1071_v40, %v1071_v40  ;;  %v588_v53 = vmul.f32 %v586_v52, %v582_v51 }
 0x409   : > { %577 = vadd.xlane.f32.xlu1 %v576_v41 }
 0x40a   : > { %950 = vmatmul.mubr.msk.bf16.vlgmr.msra.gmra.mrb[4].mxu1 %vm558_vm4, %v589_v42 }
 0x496   : > { %v578_v46 = vpop.xlane.xlu1 %577 }
 0x497   : > { %v579_v47 = vadd.f32 %v578_v46, %v575_v45 }
 0x499   : > { %581 = vst.msk [vmem:[#allocation4] sm:$0xff] %vm443_vm3, %v579_v47 }
 0x4a0   : > { %v646_v48 = vld [vmem:[#allocation4] sm:$0xff] }
 0x4a1   : > { %1072 = vrcp.f32 %v646_v48 }
 0x4ab   : > { %v1073_v49 = vpop.eup %1072 }
 0x4ac   : > { %650 = vperm.xlu1 %1062, %v1073_v49  }
 0x4dd   : > { %v633_v54 = vpop.f32.mrb[4].mxu1 }
 0x4de   : > { %v639_v55 = vadd.f32 %v633_v54, %v588_v53  ;;  %v951_v56 = vpop.f32.mrb[5].mxu1 }
 0x4df   : > { %v636_v57 = vpop.f32.mrb[6].mxu1 }
 0x4e0   : > { %640 = vst.msk [vmem:[#allocation5] sm:$0xff] %vm395_vm0, %v639_v55  ;;  %v952_v58 = vpop.f32.mrb[7].mxu1 }
 0x4e7   : > { %v645_v59 = vld [vmem:[#allocation5] sm:$0xff] }
 0x52b   : > { %v651_v60 = vpop.permute.xlu1 %650 }
 0x52c   : > { %v653_v61 = vmul.f32 %v651_v60, %v645_v59 }
 0x52e   : > { %v654_v62 = vpack.c.bf16 %v653_v61, %v653_v61 }
 0x530   : > { %958 = vmatmul.mubr.msk.bf16.vlgmr.msra.gmra.mrb[8].mxu0 %vm395_vm0, %v654_v62 }
 0x603   : > { %v708_v63 = vpop.f32.mrb[8].mxu0 }
 0x604   : > { %714 = vst.msk [vmem:[%s372_s7] sm:$0xff] %vm395_vm0, %v708_v63  ;;  %v959_v0 = vpop.f32.mrb[9].mxu0 }
 0x605   : > { %v711_v1 = vpop.f32.mrb[10].mxu0 }
 0x606   : > { %1233 = shalt.err (!%p1230_p8)
}
 0x607   : > { %s1234_s25 = scalar_lea.hbm %s1664_s11, 128  ;;  %s1238_s22 = scalar_lea.hbm %s1719_s5, 256 }
 0x608   : > { %p1235_p0 = scmp.ne.s32.totalorder %s1664_s11, %s1234_s25  ;;  %p1239_p7 = scmp.lt.u32.totalorder %s1664_s11, %s1719_s5 }
 0x609   : > { %p1240_p13 = scmp.lt.u32.totalorder %s1238_s22, %s1234_s25  ;;  %p1242_p2 = scmp.lt.u32.totalorder %s1234_s25, %s1664_s11 }
 0x60a   : > { %p1236_p5 = pnand %p1235_p0, %p1766_p4 }
 0x60b   : > { %p1241_p9 = por %p1240_p13, %p1239_p7 }
 0x60c   : > { %p1237_p12 = pneg %p1236_p5 }
 0x60d   : > { %p1243_p1 = por %p1242_p2, %p1241_p9 }
 0x60f   : > { %p1244_p3 = pnand %p1243_p1, %p1237_p12 }
 0x611   : > { %1247 = shalt.err (!%p1244_p3)
}
 0x612   : > { %975 = dma.vmem_to_hbm [thread:$0]  (%p1766_p4), %s1666_s8, 128, %s1664_s11, %s716_s30   ;;  %v960_v2 = vpop.f32.mrb[11].mxu0 }
 0x613 PF: > { %s742_s14 = sand.u32 1, %s1290_s18   ;;  %p1767_p11 = scmp.ne.s32.totalorder %s1741_s27, 0 }
 0x614   : > { %p1768_p10 = scmp.ge.s32.totalorder %s1310_s23, 2  ;;  %s743_s13 = scalar_lea.sflag [#allocation8], %s742_s14 }
 0x616   : > { %p995_p6 = pnand %p1768_p10, %p1767_p11 }
 0x618   : > { %1285 = dma.done.wait (!%p995_p6), %s743_s13, 128  }
 0x619   : > { %1287 = vsyncadd (!%p995_p6), %s743_s13, 4294967168  ;;  %s25_s23 = sadd.s32 1, %s1310_s23   ;;  %s1769_s9 = sld [smem:[#allocation22_spill]] }
 0x61a   : > { %p22_p8 = scmp.ge.s32.totalorder %s25_s23, 4   ;;  %s1770_s21 = sld [smem:[#allocation20_spill]] }
 0x61b   : > { %s1771_s22 = sld [smem:[#allocation21_spill]]  ;;  %s1772_s18 = smov %s1294_s19 }
 0x61c   : > { %s1773_s19 = smov %s1298_s20  ;;  %24 = sbr.rel (!%p22_p8) target bundleno = 13 (0xd), region = 125 }
 0x61f   : > { %s1774_s20 = smov %s1769_s9 }
 0x623   :  { %748 = vsyncpa [#allocation7], 1 }
 0x624   :  { %750 = vsyncpa [#allocation7 + $0x1], 1 }
 0x625   :  { %751 = vsyncpa [#allocation10], 1 }
 0x626   :  { %753 = vsyncpa [#allocation10 + $0x1], 1 }
 0x627   :  { %754 = vsyncpa [#allocation13], 1 }
 0x628   :  { %755 = vsyncpa [#allocation8], 1 }
 0x629   :  { %757 = vsyncpa [#allocation8 + $0x1], 1 }

</bundles_post_ra>
